<compile_context>
chip_gen: v5e
topology: v5e:2x2
jax: 0.10.0
libtpu: 0.0.40
codegen_flags: <defaults>
</compile_context>

<pallas_src>
import functools

import jax
import jax.numpy as jnp
from jax.experimental import pallas as pl
from jax.experimental.pallas import tpu as pltpu


def _pe_add_kernel(seed_ref, pe_ref, x_ref, *rest, p, training, use_tpu_prng):
    """y = x + pe (accumulated in f32), then (if training) inverted dropout."""
    o_ref = rest[-1]
    y = x_ref[...].astype(jnp.float32) + pe_ref[...].astype(jnp.float32)

    if training and p > 0.0:
        # keep with probability (1 - p): integer-space compare, no float convert.
        threshold = jnp.uint32(min(int(round(p * 2.0 ** 32)), 2 ** 32 - 1))
        if use_tpu_prng:
            # Runtime seed + grid coordinates -> distinct stream per grid point,
            # and changing the seed does NOT trigger a recompile.
            pltpu.prng_seed(seed_ref[0], pl.program_id(0), pl.program_id(1))
            bits = pltpu.prng_random_bits(y.shape)
            if bits.dtype != jnp.uint32:
                bits = pltpu.bitcast(bits, jnp.uint32)
        else:
            # Portable fallback (CPU / interpret): bits precomputed in wrapper.
            bits = rest[0][...]
        keep = bits >= threshold
        y = jnp.where(keep, y * (1.0 / (1.0 - p)), 0.0)

    o_ref[...] = y.astype(o_ref.dtype)


def _sinusoidal_pe(S, D):
    """Sinusoidal table identical to the PyTorch registered buffer."""
    pos = jnp.arange(S, dtype=jnp.float32)[:, None]                         # (S, 1)
    div = pos / jnp.power(10000.0, jnp.arange(0, D, 2, dtype=jnp.float32) / D)
    pe = jnp.zeros((S, D), jnp.float32)
    pe = pe.at[:, 0::2].set(jnp.sin(div))
    pe = pe.at[:, 1::2].set(jnp.cos(div))
    return pe                                                               # (S, D)


def _pick_seq_tile(S, D, itemsize):
    """Sequence tile size (sublane-aligned for the dtype) + scoped-VMEM limit."""
    min_sub = max(8, 32 // max(itemsize, 1))     # 8 (f32), 16 (bf16), 32 (int8/fp8)

    vmem = 64 * 1024 * 1024                      # conservative default (v7x-sized)
    if jax.default_backend() == "tpu":
        try:
            vmem = int(pltpu.get_tpu_info().vmem_capacity_bytes)
        except Exception:
            pass

    # Budget ~8 live double-buffered tiles (x, pe, out, + slack for dropout bits).
    budget = min(vmem // 3, 48 * 1024 * 1024)
    per_tile = max(budget // 8, min_sub * D * itemsize)
    ts = max(min_sub, (per_tile // (D * itemsize)) // min_sub * min_sub)
    ts = min(ts, 2048)
    if S <= min_sub:
        ts = S                                   # full-extent block is always legal
    else:
        ts = min(ts, (S // min_sub) * min_sub)   # never exceed the (aligned) array

    vmem_limit = min(vmem, 128 * 1024 * 1024) // 2   # 64 MiB on v5e/v6e, 32 MiB on v7x
    return ts, vmem_limit


def positional_encoding(x, *, p=0.1, training=False, seed=0):
    """x: (B, S, D). Returns dropout(x + PE[:S]) matching the PyTorch module."""
    B, S, D = x.shape
    assert D % 2 == 0, "d_model must be even (same constraint as the PyTorch module)"
    itemsize = jnp.dtype(x.dtype).itemsize

    # Batch-independent buffer, precomputed once; cast to activation dtype to
    # halve its HBM/VMEM footprint (add still happens in f32 in-kernel).
    pe = _sinusoidal_pe(S, D).astype(x.dtype)

    TS, vmem_limit = _pick_seq_tile(S, D, itemsize)
    num_s_tiles = pl.cdiv(S, TS)

    use_tpu_prng = jax.default_backend() == "tpu"
    need_bits = bool(training) and float(p) > 0.0 and not use_tpu_prng

    # Grid ordering: larger-extent axis leading (megacore sharding on v7x); when
    # the sequence axis leads, the PE block stays resident across the batch loop.
    if num_s_tiles >= 2:
        grid = (num_s_tiles, B)

        def _sb(g0, g1):
            return g0, g1          # (s, b)
    else:
        grid = (B, num_s_tiles)

        def _sb(g0, g1):
            return g1, g0          # (s, b)

    def pe_map(g0, g1, seed_ref):
        s, _ = _sb(g0, g1)
        return (s, 0)

    def x_map(g0, g1, seed_ref):
        s, b = _sb(g0, g1)
        return (b, s, 0)

    in_specs = [
        pl.BlockSpec((TS, D), pe_map),          # PE tile reused across batch
        pl.BlockSpec((None, TS, D), x_map),     # batch dim squeezed
    ]
    args = [pe, x]
    if need_bits:
        bits = jax.random.bits(jax.random.PRNGKey(int(seed)), (B, S, D),
                               dtype=jnp.uint32)
        in_specs.append(pl.BlockSpec((None, TS, D), x_map))
        args.append(bits)

    kernel = functools.partial(
        _pe_add_kernel, p=float(p), training=bool(training),
        use_tpu_prng=use_tpu_prng,
    )

    bytes_accessed = 2 * B * S * D * itemsize + S * D * itemsize
    if need_bits:
        bytes_accessed += B * S * D * 4
    flops = B * S * D * (3 if (training and p > 0.0) else 1)

    seed_arr = jnp.asarray(seed, dtype=jnp.int32).reshape((1,))

    return pl.pallas_call(
        kernel,
        out_shape=jax.ShapeDtypeStruct((B, S, D), x.dtype),
        grid_spec=pltpu.PrefetchScalarGridSpec(
            num_scalar_prefetch=1,
            grid=grid,
            in_specs=in_specs,
            out_specs=pl.BlockSpec((None, TS, D), x_map),
        ),
        compiler_params=pltpu.CompilerParams(
            dimension_semantics=("parallel", "parallel"),
            vmem_limit_bytes=int(vmem_limit),
        ),
        cost_estimate=pl.CostEstimate(
            flops=int(flops), transcendentals=0, bytes_accessed=int(bytes_accessed)
        ),
    )(seed_arr, *args)


if __name__ == "__main__":
    # Small shapes consistent with the module: batch=2, seq=8, d_model=512.
    B, S, D = 2, 8, 512
    key = jax.random.PRNGKey(0)
    x = jax.random.normal(key, (B, S, D), dtype=jnp.float32)

    # Eval-mode forward (dropout == identity) — deterministic, checkable.
    y = positional_encoding(x, p=0.1, training=False)
    y = jax.block_until_ready(y)

    y_ref = x + _sinusoidal_pe(S, D)[None]
    assert y.shape == (B, S, D)
    assert jnp.allclose(y, y_ref, atol=1e-5, rtol=1e-5), "mismatch vs reference"

    # Training-mode forward — exercise the dropout path (stochastic, sanity only).
    y_tr = positional_encoding(x, p=0.1, training=True, seed=1234)
    y_tr = jax.block_until_ready(y_tr)
    assert y_tr.shape == (B, S, D)
    assert bool(jnp.all(jnp.isfinite(y_tr)))
    # Dropped positions are exactly zero; kept positions equal (x+pe)/(1-p).
    dropped_frac = float(jnp.mean((y_tr == 0.0).astype(jnp.float32)))
    assert 0.0 <= dropped_frac <= 0.5, "dropout rate wildly off"

    print("KERNEL_OK")
</pallas_src>

<mosaic_0001>
module attributes {stable_mosaic.version = 11 : i64} {
  func.func @_pe_add_kernel(%arg0: i32, %arg1: i32, %arg2: memref<1xi32, #tpu.memory_space<smem>>, %arg3: memref<8x512xf32, #tpu.memory_space<vmem>>, %arg4: memref<1x8x512xf32, #tpu.memory_space<vmem>>, %arg5: memref<1x8x512xf32, #tpu.memory_space<vmem>>) attributes {dimension_semantics = [#tpu.dimension_semantics<parallel>, #tpu.dimension_semantics<parallel>], iteration_bounds = array<i64: 2, 1>, scalar_prefetch = 1 : i64, scratch_operands = 0 : i64, tpu.core_type = #tpu.core_type<tc>, window_params = [{transform_indices = @transform_0, window_bounds = array<i64: 8, 512>}, {transform_indices = @transform_1, window_bounds = array<i64: 1, 8, 512>}, {transform_indices = @transform_2, window_bounds = array<i64: 1, 8, 512>}]} {
    %c0 = arith.constant 0 : index
    %c0_0 = arith.constant 0 : index
    %c0_1 = arith.constant 0 : index
    %0 = vector.load %arg4[%c0, %c0_0, %c0_1] : memref<1x8x512xf32, #tpu.memory_space<vmem>>, vector<1x8x512xf32>
    %1 = vector.shape_cast %0 : vector<1x8x512xf32> to vector<8x512xf32>
    %c0_2 = arith.constant 0 : index
    %c0_3 = arith.constant 0 : index
    %2 = vector.load %arg3[%c0_2, %c0_3] : memref<8x512xf32, #tpu.memory_space<vmem>>, vector<8x512xf32>
    %3 = arith.addf %1, %2 : vector<8x512xf32>
    %c0_4 = arith.constant 0 : index
    %c0_5 = arith.constant 0 : index
    %c0_6 = arith.constant 0 : index
    %4 = vector.load %arg5[%c0_4, %c0_5, %c0_6] : memref<1x8x512xf32, #tpu.memory_space<vmem>>, vector<1x8x512xf32>
    %5 = vector.shape_cast %4 : vector<1x8x512xf32> to vector<8x512xf32>
    %6 = vector.shape_cast %3 : vector<8x512xf32> to vector<1x8x512xf32>
    tpu.vector_store %arg5[%c0_4, %c0_5, %c0_6], %6 {strides = array<i32>} : memref<1x8x512xf32, #tpu.memory_space<vmem>>, vector<1x8x512xf32>,
    return
  }
  func.func @transform_0(%arg0: i32, %arg1: i32, %arg2: memref<1xi32, #tpu.memory_space<smem>>) -> (i32, i32) {
    %c0_i32 = arith.constant 0 : i32
    %c0_i32_0 = arith.constant 0 : i32
    return %arg1, %c0_i32 : i32, i32
  }
  func.func @transform_1(%arg0: i32, %arg1: i32, %arg2: memref<1xi32, #tpu.memory_space<smem>>) -> (i32, i32, i32) {
    %c0_i32 = arith.constant 0 : i32
    %c0_i32_0 = arith.constant 0 : i32
    return %arg0, %arg1, %c0_i32 : i32, i32, i32
  }
  func.func @transform_2(%arg0: i32, %arg1: i32, %arg2: memref<1xi32, #tpu.memory_space<smem>>) -> (i32, i32, i32) {
    %c0_i32 = arith.constant 0 : i32
    %c0_i32_0 = arith.constant 0 : i32
    return %arg0, %arg1, %c0_i32 : i32, i32, i32
  }
}

</mosaic_0001>

<bundles_post_ra>
// kernel: tpu_custom_call.1
= control target key start
LH: loop header
LB: loop body
LE: loop exit
PB: predicated region body
PF: predicated region fallthrough
CT: control target
= control target key end

     0   :  { %9 = vsyncpa [#allocation5], 0  ;;  %s748_s0 = inlined_call_operand.<no memory space> [shape: s32[1], index: 0, kind: input, shape index: {}]   ;;  %s749_s1 = inlined_call_operand.hbm [shape: f32[8,512], index: 1, kind: input, shape index: {}]   ;;  %s750_s2 = inlined_call_operand.hbm [shape: f32[2,8,512], index: 2, kind: input, shape index: {}]   ;;  %s751_s3 = inlined_call_operand.hbm [shape: f32[2,8,512], index: 3, kind: output, shape index: {}]  }
   0x1   :  { %10 = vsyncpa [#allocation8], 0 }
   0x2   :  { %12 = vsyncpa [#allocation8 + $0x1], 0 }
   0x3   :  { %13 = vsyncpa [#allocation6], 0 }
   0x4   :  { %15 = vsyncpa [#allocation6 + $0x1], 0  ;;  %s599_s12 = smov 0   ;;  %s601_s13 = smov 0  }
   0x5   :  { %s603_s14 = smov 0   ;;  %s605_s0 = smov 0  }
   0x6   :  { %s607_s15 = smov 0   ;;  %s609_s16 = smov 0  }
   0x7 LB: > { %s338_s17 = sadd.s32 4294967295, %s576_s16   ;;  %s339_s18 = sadd.s32 4294967294, %s576_s16   ;;  %s576_s16 = sphi %s609_s16, %s21_s16   ;;  %s572_s15 = sphi %s607_s15, %s763_s15   ;;  %s568_s0 = sphi %s605_s0, %s762_s0   ;;  %s564_s14 = sphi %s603_s14, %s761_s14   ;;  %s560_s13 = sphi %s601_s13, %s760_s13   ;;  %s556_s12 = sphi %s599_s12, %s759_s12  }
   0x8   : > { %p81_p0 = scmp.ne.s32.totalorder %s560_s13, %s556_s12  ;;  %p633_p1 = scmp.eq.s32.totalorder %s338_s17, 0 }
   0x9   : > { %p637_p2 = scmp.eq.s32.totalorder %s338_s17, 1  ;;  %p113_p3 = scmp.eq.s32.totalorder %s339_s18, 1 }
   0xa   : > { %p643_p4 = por %p633_p1, %p81_p0  ;;  %p340_p5 = scmp.ge.s32.totalorder %s576_s16, 1 }
   0xb   : > { %p648_p6 = por %p113_p3, %p81_p0  ;;  %p120_p7 = scmp.lt.s32.totalorder %s576_s16, 3 }
   0xc   : > { %s135_s25 = sshll.u32 %s749_s1, 4  ;;  %p342_p9 = scmp.ge.s32.totalorder %s576_s16, 2  ;;  %s136_s25 = int_to_ptr.hbm [resolvable:$true] %s135_s25 }
   0xd   : > { %p656_p8 = pnand %p340_p5, %p120_p7  ;;  %s578_s27 = smov [#allocation4]  }
   0xe   : > { %s137_s28 = sshll.u32 %s578_s27, 4  ;;  %s33_s29 = sadd.s32 1, %s572_s15  ;;  %s138_s28 = int_to_ptr.vmem [resolvable:$true] %s137_s28 }
   0xf   : > { %p365_p10 = pneg %p656_p8  ;;  %p35_p12 = scmp.ge.s32.totalorder %s33_s29, 2 }
  0x10   : > { %s68_s30 = sadd.s32 1, %s564_s14  ;;  %p75_p13 = scmp.ne.s32.totalorder %s564_s14, %s560_s13 }
  0x11   : > { %p366_p11 = pnand %p365_p10, %p633_p1  ;;  %p76_p0 = scmp.eq.s32.totalorder %s576_s16, 0 }
  0x12   : > { %s765_s29 = smov (%p35_p12, %s33_s29), 0  ;;  %p678_p5 = por %p637_p2, %p75_p13 }
  0x13   : > { %368 = dma.hbm_to_vmem [thread:$0]  (!%p366_p11), %s136_s25, 512, %s138_s28, [#allocation5]  }
  0x14   : > { %p672_p3 = por %p76_p0, %p75_p13  ;;  %s63_s6 = ssub.s32 %s572_s15, %s765_s29 }
  0x15   : > { %p378_p7 = scmp.lt.s32.totalorder %s576_s16, 2  ;;  %p66_p10 = scmp.eq.s32.totalorder %s63_s6, 0 }
  0x16   : > { %s148_s7 = sand.u32 1, %s564_s14   ;;  %s355_s10 = sshll.u32 %s572_s15, 5 }
  0x17   : > { %s343_s8 = sshll.u32 %s148_s7, 5  ;;  %s159_s18 = scalar_lea.hbm %s750_s2, %s355_s10 }
  0x18   : > { %s687_s9 = scalar_select %p66_p10, %s564_s14, %s68_s30  }
  0x19   : > { %s152_s23 = scalar_lea.vmem [#allocation7], %s343_s8  ;;  %s161_s20 = sshll.u32 %s159_s18, 4  ;;  %s162_s20 = int_to_ptr.hbm [resolvable:$true] %s161_s20 }
  0x1a   : > { %s163_s24 = sshll.u32 %s152_s23, 4  ;;  %p370_p2 = pnand %p378_p7, %p672_p3  ;;  %s164_s24 = int_to_ptr.vmem [resolvable:$true] %s163_s24 }
  0x1b   : > { %s149_s25 = scalar_lea.sflag [#allocation8], %s148_s7  ;;  %172 = sbr.rel (%p656_p8) target bundleno = 52 (0x34), region = 28 }
  0x1c   : > { %372 = dma.hbm_to_vmem [thread:$0]  (!%p370_p2), %s162_s20, 512, %s164_s24, %s149_s25  }
  0x20   : > { %543 = dma.done.wait (%p633_p1), [#allocation5], 512  }
  0x21   : > { %545 = vsyncadd (%p633_p1), [#allocation5], 4294966784  ;;  %s702_s27 = sand.u32 1, %s560_s13  }
  0x22   : > { %s348_s28 = sshll.u32 %s702_s27, 5  ;;  %s180_s30 = scalar_lea.sflag [#allocation8], %s702_s27 }
  0x23   : > { %s183_s4 = scalar_lea.vmem [#allocation7], %s348_s28 }
  0x24   : > { %547 = dma.done.wait (%p643_p4), %s180_s30, 512  }
  0x25   : > { %549 = vsyncadd (%p643_p4), %s180_s30, 4294966784  ;;  %s356_s26 = sshll.u32 %s568_s0, 5  ;;  %v205_v0 = vld [vmem:[%s183_s4] sm:$0xff]  ;;  %v206_v2 = vld [vmem:[%s183_s4 + $0x8] sm:$0xff]  ;;  %s204_s8 = scalar_lea.vmem [#allocation9], %s348_s28 }
  0x26   : > { %s235_s19 = scalar_lea.hbm %s751_s3, %s356_s26  ;;  %v209_v1 = vld [vmem:[#allocation4] sm:$0xff]  ;;  %s237_s10 = sshll.u32 %s204_s8, 4  ;;  %v210_v4 = vld [vmem:[#allocation4 + $0x8] sm:$0xff]  ;;  %v207_v5 = vld [vmem:[%s183_s4 + $0x10] sm:$0xff]  ;;  %s238_s10 = int_to_ptr.vmem [resolvable:$true] %s237_s10 }
  0x27   : > { %v213_v3 = vadd.f32 %v209_v1, %v205_v0  ;;  %v211_v6 = vld [vmem:[#allocation4 + $0x10] sm:$0xff]  ;;  %s239_s11 = sshll.u32 %s235_s19, 4  ;;  %v214_v7 = vadd.f32 %v210_v4, %v206_v2  ;;  %v208_v9 = vld [vmem:[%s183_s4 + $0x18] sm:$0xff]  ;;  %s222_s0 = scalar_lea.sflag [#allocation6], %s702_s27  ;;  %s240_s11 = int_to_ptr.hbm [resolvable:$true] %s239_s11 }
  0x28   : > { %v215_v8 = vadd.f32 %v211_v6, %v207_v5  ;;  %v212_v10 = vld [vmem:[#allocation4 + $0x18] sm:$0xff]  ;;  %s504_s21 = sshra.s32 %s240_s11, 4  ;;  %s510_s24 = scalar_lea.hbm %s751_s3, 64  ;;  %s505_s21 = int_to_ptr.hbm [resolvable:$true] %s504_s21 }
  0x29   : > { %217 = vst [vmem:[%s204_s8] sm:$0xff] %v213_v3  ;;  %v216_v11 = vadd.f32 %v212_v10, %v208_v9  ;;  %s506_s17 = scalar_lea.hbm %s505_s21, 32  ;;  %p511_p11 = scmp.lt.s32.totalorder %s505_s21, %s751_s3 }
  0x2a   : > { %218 = vst [vmem:[%s204_s8 + $0x8] sm:$0xff] %v214_v7  ;;  %p507_p1 = scmp.ne.s32.totalorder %s505_s21, %s506_s17  ;;  %p512_p12 = scmp.lt.s32.totalorder %s510_s24, %s506_s17 }
  0x2b   : > { %219 = vst [vmem:[%s204_s8 + $0x10] sm:$0xff] %v215_v8 }
  0x2c   : > { %220 = vst [vmem:[%s204_s8 + $0x18] sm:$0xff] %v216_v11  ;;  %p508_p4 = pnand %p507_p1, %p678_p5  ;;  %p513_p13 = por %p512_p12, %p511_p11 }
  0x2e   : > { %p509_p8 = pneg %p508_p4 }
  0x30   : > { %p514_p0 = pnand %p513_p13, %p509_p8 }
  0x32   : > { %517 = shalt.err (!%p514_p0)
}
  0x33   : > { %363 = dma.vmem_to_hbm [thread:$0]  (%p678_p5), %s238_s10, 512, %s240_s11, %s222_s0  }
  0x34 PF: > { %s251_s27 = sand.u32 1, %s556_s12   ;;  %p374_p3 = pnand %p342_p9, %p648_p6 }
  0x35   : > { %s252_s28 = scalar_lea.sflag [#allocation6], %s251_s27 }
  0x36   : > { %p375_p7 = pneg %p374_p3 }
  0x38   : > { %551 = dma.done.wait (%p375_p7), %s252_s28, 512  }
  0x39   : > { %553 = vsyncadd (%p375_p7), %s252_s28, 4294966784  ;;  %s21_s16 = sadd.s32 1, %s576_s16   ;;  %s759_s12 = smov %s560_s13 }
  0x3a   : > { %p18_p10 = scmp.ge.s32.totalorder %s21_s16, 4   ;;  %s760_s13 = smov %s564_s14 }
  0x3b   : > { %s761_s14 = smov %s687_s9  ;;  %s762_s0 = smov %s572_s15 }
  0x3c   : > { %s763_s15 = smov %s765_s29  ;;  %20 = sbr.rel (!%p18_p10) target bundleno = 7 (0x7), region = 79 }
  0x41   :  { %258 = vsyncpa [#allocation5], 1 }
  0x42   :  { %260 = vsyncpa [#allocation5 + $0x1], 1 }
  0x43   :  { %261 = vsyncpa [#allocation8], 1 }
  0x44   :  { %263 = vsyncpa [#allocation8 + $0x1], 1 }
  0x45   :  { %264 = vsyncpa [#allocation6], 1 }
  0x46   :  { %266 = vsyncpa [#allocation6 + $0x1], 1 }

</bundles_post_ra>
